<compile_context>
chip_gen: v7x
topology: tpu7x:2x2x1
jax: 0.10.0
libtpu: 0.0.40
codegen_flags: <defaults>
</compile_context>

<pallas_src>
import functools
import math

import jax
import jax.numpy as jnp
from jax.experimental import pallas as pl
from jax.experimental.pallas import tpu as pltpu

KS = 4                      # every conv in this discriminator is 4x4
_VMEM_LIMIT = 32 * 1024 * 1024
_MAX_TILE_P = 512


def _round_up(x, m):
    return (x + m - 1) // m * m


# ---------------------------------------------------------------------------
# Pallas kernels
# ---------------------------------------------------------------------------
def _mm_act_kernel(p_ref, w_ref, y_ref, *, act):
    """bf16 patches-tile @ bf16 weights -> f32, fused activation (no BN)."""
    y = jnp.dot(p_ref[...], w_ref[...], preferred_element_type=jnp.float32)
    if act == "leakyrelu":
        y = jnp.where(y >= 0, y, 0.2 * y)
    elif act == "sigmoid":
        y = 1.0 / (1.0 + jnp.exp(-y))
    y_ref[...] = y.astype(y_ref.dtype)


def _mm_stats_kernel(p_ref, w_ref, y_ref, sum_ref, ssq_ref):
    """Matmul tile + per-tile channel sum / sum-of-squares (for global BN)."""
    y = jnp.dot(p_ref[...], w_ref[...], preferred_element_type=jnp.float32)
    y_ref[...] = y
    s = jnp.sum(y, axis=0, keepdims=True)          # (1, Cout_pad)  VPU, hidden
    q = jnp.sum(y * y, axis=0, keepdims=True)      # under the MXU work
    row = jax.lax.broadcasted_iota(jnp.int32, sum_ref.shape, 0)
    sum_ref[...] = jnp.where(row == 0, s, 0.0)     # row 0 carries the partials
    ssq_ref[...] = jnp.where(row == 0, q, 0.0)


def _bn_lrelu_kernel(y_ref, mean_ref, rstd_ref, o_ref):
    """Apply global batch-norm (gamma=1, beta=0) + LeakyReLU(0.2)."""
    y = (y_ref[...] - mean_ref[...]) * rstd_ref[...]
    o_ref[...] = jnp.where(y >= 0, y, 0.2 * y).astype(o_ref.dtype)


# ---------------------------------------------------------------------------
# pallas_call wrappers (row-tiled grid, 'parallel' for megacore on v7x)
# ---------------------------------------------------------------------------
def _mm_cost(p_pad, k, cout_pad):
    return pl.CostEstimate(
        flops=2 * p_pad * k * cout_pad,
        transcendentals=0,
        bytes_accessed=p_pad * k * 2 + k * cout_pad * 2 + p_pad * cout_pad * 4)


def _conv_matmul_act(patches, wmat, tile_p, act):
    p_pad, k = patches.shape
    cout_pad = wmat.shape[1]
    n_tiles = p_pad // tile_p
    kernel = functools.partial(_mm_act_kernel, act=act)
    return pl.pallas_call(
        kernel,
        out_shape=jax.ShapeDtypeStruct((p_pad, cout_pad), jnp.float32),
        grid_spec=pltpu.PrefetchScalarGridSpec(
            num_scalar_prefetch=0,
            grid=(n_tiles,),
            in_specs=[pl.BlockSpec((tile_p, k), lambda i: (i, 0)),
                      pl.BlockSpec((k, cout_pad), lambda i: (0, 0))],
            out_specs=pl.BlockSpec((tile_p, cout_pad), lambda i: (i, 0))),
        compiler_params=pltpu.CompilerParams(
            dimension_semantics=("parallel",),
            vmem_limit_bytes=_VMEM_LIMIT),
        cost_estimate=_mm_cost(p_pad, k, cout_pad),
    )(patches, wmat)


def _conv_matmul_stats(patches, wmat, tile_p):
    p_pad, k = patches.shape
    cout_pad = wmat.shape[1]
    n_tiles = p_pad // tile_p
    return pl.pallas_call(
        _mm_stats_kernel,
        out_shape=(jax.ShapeDtypeStruct((p_pad, cout_pad), jnp.float32),
                   jax.ShapeDtypeStruct((n_tiles * 8, cout_pad), jnp.float32),
                   jax.ShapeDtypeStruct((n_tiles * 8, cout_pad), jnp.float32)),
        grid_spec=pltpu.PrefetchScalarGridSpec(
            num_scalar_prefetch=0,
            grid=(n_tiles,),
            in_specs=[pl.BlockSpec((tile_p, k), lambda i: (i, 0)),
                      pl.BlockSpec((k, cout_pad), lambda i: (0, 0))],
            out_specs=(pl.BlockSpec((tile_p, cout_pad), lambda i: (i, 0)),
                       pl.BlockSpec((8, cout_pad), lambda i: (i, 0)),
                       pl.BlockSpec((8, cout_pad), lambda i: (i, 0)))),
        compiler_params=pltpu.CompilerParams(
            dimension_semantics=("parallel",),
            vmem_limit_bytes=_VMEM_LIMIT),
        cost_estimate=_mm_cost(p_pad, k, cout_pad),
    )(patches, wmat)


def _bn_lrelu(y, mean, rstd, tile_p):
    p_pad, cout_pad = y.shape
    n_tiles = p_pad // tile_p
    return pl.pallas_call(
        _bn_lrelu_kernel,
        out_shape=jax.ShapeDtypeStruct((p_pad, cout_pad), jnp.float32),
        grid_spec=pltpu.PrefetchScalarGridSpec(
            num_scalar_prefetch=0,
            grid=(n_tiles,),
            in_specs=[pl.BlockSpec((tile_p, cout_pad), lambda i: (i, 0)),
                      pl.BlockSpec((1, cout_pad), lambda i: (0, 0)),
                      pl.BlockSpec((1, cout_pad), lambda i: (0, 0))],
            out_specs=pl.BlockSpec((tile_p, cout_pad), lambda i: (i, 0))),
        compiler_params=pltpu.CompilerParams(
            dimension_semantics=("parallel",),
            vmem_limit_bytes=_VMEM_LIMIT),
    )(y, mean, rstd)


# ---------------------------------------------------------------------------
# JAX glue: NHWC im2col (forward conv, no structural zeros) + ConvBlock
# ---------------------------------------------------------------------------
def _im2col(x, stride, pad):
    """x: (N, H, W, C) NHWC -> (N*Ho*Wo, k*k*C), channel fastest inside (ki,kj)."""
    n, h, w, c = x.shape
    ho = (h + 2 * pad - KS) // stride + 1
    wo = (w + 2 * pad - KS) // stride + 1
    if pad:
        x = jnp.pad(x, ((0, 0), (pad, pad), (pad, pad), (0, 0)))
    cols = []
    for ki in range(KS):
        for kj in range(KS):
            cols.append(x[:, ki:ki + (ho - 1) * stride + 1:stride,
                             kj:kj + (wo - 1) * stride + 1:stride, :])
    patches = jnp.concatenate(cols, axis=-1)          # (N, Ho, Wo, k*k*C)
    return patches.reshape(n * ho * wo, KS * KS * c), ho, wo


def _prep_weight(w_oihw, cout_pad):
    """(Cout, Cin, k, k) -> (k*k*Cin, Cout_pad) bf16, matching im2col ordering."""
    cout = w_oihw.shape[0]
    wm = jnp.transpose(w_oihw, (2, 3, 1, 0)).reshape(-1, cout)   # (k*k*Cin, Cout)
    wm = jnp.pad(wm, ((0, 0), (0, cout_pad - cout)))             # lane-dense cols
    return wm.astype(jnp.bfloat16)


def conv_block(x_nhwc, wmat, cout, stride, pad, use_bn, act):
    """One ConvBlock (Conv2d bias=False -> [BatchNorm] -> activation). NHWC."""
    n = x_nhwc.shape[0]
    patches, ho, wo = _im2col(x_nhwc, stride, pad)
    p_true, k = patches.shape
    tile_p = min(_MAX_TILE_P, _round_up(p_true, 16))
    p_pad = _round_up(p_true, tile_p)
    if p_pad > p_true:
        patches = jnp.pad(patches, ((0, p_pad - p_true), (0, 0)))
    patches = patches.astype(jnp.bfloat16)

    if use_bn:
        y, psum, pssq = _conv_matmul_stats(patches, wmat, tile_p)
        # Tiny per-channel reduction (padded rows contribute zero).
        s = jnp.sum(psum, axis=0)
        q = jnp.sum(pssq, axis=0)
        mean = s / p_true
        var = jnp.maximum(q / p_true - mean * mean, 0.0)   # biased var (train BN)
        rstd = jax.lax.rsqrt(var + 1e-5)
        y = _bn_lrelu(y, mean.reshape(1, -1), rstd.reshape(1, -1), tile_p)
    else:
        y = _conv_matmul_act(patches, wmat, tile_p, act)

    return y[:p_true, :cout].reshape(n, ho, wo, cout)


# ---------------------------------------------------------------------------
# Conditional_DCGAN_D
# ---------------------------------------------------------------------------
class ConditionalDCGAND:
    def __init__(self, sz, nc, n_classes, ndf, key, use_sigmoid=True, use_bn=True):
        assert sz > 4 and sz & (sz - 1) == 0
        self.sz, self.nc, self.n_classes, self.ndf = sz, nc, n_classes, ndf
        self.use_sigmoid = use_sigmoid
        # (cin, cout, stride, pad, use_bn, act)
        cfgs = [(nc, ndf, 2, 1, False, "leakyrelu")]              # first_conv
        cur = ndf
        for i in range(int(math.log2(sz)) - 3):
            cin = cur + n_classes if i == 0 else cur
            cfgs.append((cin, cur * 2, 2, 1, use_bn, "leakyrelu"))
            cur *= 2
        # final conv: no BN, activation is Nothing(); sigmoid fused here.
        cfgs.append((cur, 1, 1, 0, False, "sigmoid" if use_sigmoid else None))
        self.cfgs = cfgs

        # weight init normal(0, 0.02), bias-free convs (matches the module).
        self.weights_oihw = []
        self.wmats = []
        for (ci, co, *_rest) in cfgs:
            key, sub = jax.random.split(key)
            w = 0.02 * jax.random.normal(sub, (co, ci, KS, KS), dtype=jnp.float32)
            self.weights_oihw.append(w)
            self.wmats.append(_prep_weight(w, _round_up(co, 128)))

    def __call__(self, x_nchw, y_onehot):
        out = jnp.transpose(x_nchw, (0, 2, 3, 1))        # NHWC end-to-end
        (_, co, s, p, bn, act) = self.cfgs[0]
        out = conv_block(out, self.wmats[0], co, s, p, bn, act)
        # concat the class map broadcast over (sz/2, sz/2)
        n, ho, wo, _ = out.shape
        ymap = jnp.broadcast_to(
            y_onehot.reshape(n, 1, 1, self.n_classes), (n, ho, wo, self.n_classes))
        out = jnp.concatenate([out, ymap], axis=-1)
        for (_, co, s, p, bn, act), wmat in zip(self.cfgs[1:], self.wmats[1:]):
            out = conv_block(out, wmat, co, s, p, bn, act)
        return jnp.transpose(out, (0, 3, 1, 2))          # NCHW only at boundary


# ---------------------------------------------------------------------------
# Pure-JAX reference (for a loose numerical sanity check of the kernels)
# ---------------------------------------------------------------------------
def reference_forward(model, x_nchw, y_onehot):
    def conv(x, w, s, p):
        return jax.lax.conv_general_dilated(
            x, jnp.transpose(w, (2, 3, 1, 0)), (s, s), [(p, p), (p, p)],
            dimension_numbers=("NHWC", "HWIO", "NHWC"))

    def block(x, w, s, p, bn, act):
        y = conv(x, w, s, p)
        if bn:
            m = jnp.mean(y, axis=(0, 1, 2), keepdims=True)
            v = jnp.mean((y - m) ** 2, axis=(0, 1, 2), keepdims=True)
            y = (y - m) * jax.lax.rsqrt(v + 1e-5)
        if act == "leakyrelu":
            y = jnp.where(y >= 0, y, 0.2 * y)
        elif act == "sigmoid":
            y = 1.0 / (1.0 + jnp.exp(-y))
        return y

    out = jnp.transpose(x_nchw, (0, 2, 3, 1))
    (_, _, s, p, bn, act) = model.cfgs[0]
    out = block(out, model.weights_oihw[0], s, p, bn, act)
    n, ho, wo, _ = out.shape
    ymap = jnp.broadcast_to(
        y_onehot.reshape(n, 1, 1, model.n_classes), (n, ho, wo, model.n_classes))
    out = jnp.concatenate([out, ymap], axis=-1)
    for (_, _, s, p, bn, act), w in zip(model.cfgs[1:], model.weights_oihw[1:]):
        out = block(out, w, s, p, bn, act)
    return jnp.transpose(out, (0, 3, 1, 2))


if __name__ == "__main__":
    # small shapes consistent with the module: sz=16, nc=3, n_classes=4, ndf=16
    sz, nc, n_classes, ndf, batch = 16, 3, 4, 16, 2

    key = jax.random.PRNGKey(0)
    kx, ky, kw = jax.random.split(key, 3)
    x = jax.random.normal(kx, (batch, nc, sz, sz), dtype=jnp.float32)
    labels = jax.random.randint(ky, (batch,), 0, n_classes)
    y = jax.nn.one_hot(labels, n_classes, dtype=jnp.float32)

    model = ConditionalDCGAND(sz, nc, n_classes, ndf, kw)
    out = jax.block_until_ready(jax.jit(model.__call__)(x, y))
    assert out.shape == (batch, 1, 1, 1), out.shape
    assert bool(jnp.all(jnp.isfinite(out)))

    ref = jax.block_until_ready(reference_forward(model, x, y))
    max_err = float(jnp.max(jnp.abs(out - ref)))
    assert max_err < 5e-2, max_err   # bf16 MXU vs f32 reference
    print("KERNEL_OK")
</pallas_src>

<mosaic_0001>
module attributes {stable_mosaic.version = 11 : i64} {
  func.func @_mm_act_kernel(%arg0: i32, %arg1: memref<128x48xbf16, #tpu.memory_space<vmem>>, %arg2: memref<48x128xbf16, #tpu.memory_space<vmem>>, %arg3: memref<128x128xf32, #tpu.memory_space<vmem>>) attributes {dimension_semantics = [#tpu.dimension_semantics<parallel>], iteration_bounds = array<i64: 1>, scalar_prefetch = 0 : i64, scratch_operands = 0 : i64, tpu.core_type = #tpu.core_type<tc>, window_params = [{transform_indices = @transform_0, window_bounds = array<i64: 128, 48>}, {pipeline_mode = #tpu.pipeline_mode<synchronous>, transform_indices = @transform_1, window_bounds = array<i64: 48, 128>}, {transform_indices = @transform_2, window_bounds = array<i64: 128, 128>}]} {
    %c0 = arith.constant 0 : index
    %c0_0 = arith.constant 0 : index
    %0 = vector.load %arg1[%c0, %c0_0] : memref<128x48xbf16, #tpu.memory_space<vmem>>, vector<128x48xbf16>
    %c0_1 = arith.constant 0 : index
    %c0_2 = arith.constant 0 : index
    %1 = vector.load %arg2[%c0_1, %c0_2] : memref<48x128xbf16, #tpu.memory_space<vmem>>, vector<48x128xbf16>
    %cst = arith.constant dense<0.000000e+00> : vector<128x128xf32>
    %2 = tpu.matmul %0, %1, %cst {dimension_numbers = #tpu.dot_dimension_numbers<[1], [0], [0], [1], [0, 0, 1, 1], [], []>} : vector<128x48xbf16>, vector<48x128xbf16>, vector<128x128xf32> -> vector<128x128xf32>
    %cst_3 = arith.constant 0.000000e+00 : f32
    %3 = vector.broadcast %cst_3 : f32 to vector<128x128xf32>
    %4 = arith.cmpf oge, %2, %3 : vector<128x128xf32>
    %cst_4 = arith.constant 2.000000e-01 : f32
    %5 = vector.broadcast %cst_4 : f32 to vector<128x128xf32>
    %6 = arith.mulf %5, %2 : vector<128x128xf32>
    %7 = arith.select %4, %2, %6 : vector<128x128xi1>, vector<128x128xf32>
    %c0_5 = arith.constant 0 : index
    %c0_6 = arith.constant 0 : index
    %8 = vector.load %arg3[%c0_5, %c0_6] : memref<128x128xf32, #tpu.memory_space<vmem>>, vector<128x128xf32>
    tpu.vector_store %arg3[%c0_5, %c0_6], %7 {strides = array<i32>} : memref<128x128xf32, #tpu.memory_space<vmem>>, vector<128x128xf32>,
    return
  }
  func.func @transform_0(%arg0: i32) -> (i32, i32) {
    %c0_i32 = arith.constant 0 : i32
    %c0_i32_0 = arith.constant 0 : i32
    return %arg0, %c0_i32 : i32, i32
  }
  func.func @transform_1(%arg0: i32) -> (i32, i32) {
    %c0_i32 = arith.constant 0 : i32
    %c0_i32_0 = arith.constant 0 : i32
    %c0_i32_1 = arith.constant 0 : i32
    return %c0_i32, %c0_i32_0 : i32, i32
  }
  func.func @transform_2(%arg0: i32) -> (i32, i32) {
    %c0_i32 = arith.constant 0 : i32
    %c0_i32_0 = arith.constant 0 : i32
    return %arg0, %c0_i32 : i32, i32
  }
}

module attributes {stable_mosaic.version = 11 : i64} {
  func.func @_mm_stats_kernel(%arg0: i32, %arg1: memref<32x320xbf16, #tpu.memory_space<vmem>>, %arg2: memref<320x128xbf16, #tpu.memory_space<vmem>>, %arg3: memref<32x128xf32, #tpu.memory_space<vmem>>, %arg4: memref<8x128xf32, #tpu.memory_space<vmem>>, %arg5: memref<8x128xf32, #tpu.memory_space<vmem>>) attributes {dimension_semantics = [#tpu.dimension_semantics<parallel>], iteration_bounds = array<i64: 1>, scalar_prefetch = 0 : i64, scratch_operands = 0 : i64, tpu.core_type = #tpu.core_type<tc>, window_params = [{transform_indices = @transform_0, window_bounds = array<i64: 32, 320>}, {pipeline_mode = #tpu.pipeline_mode<synchronous>, transform_indices = @transform_1, window_bounds = array<i64: 320, 128>}, {transform_indices = @transform_2, window_bounds = array<i64: 32, 128>}, {transform_indices = @transform_3, window_bounds = array<i64: 8, 128>}, {transform_indices = @transform_4, window_bounds = array<i64: 8, 128>}]} {
    %c0 = arith.constant 0 : index
    %c0_0 = arith.constant 0 : index
    %0 = vector.load %arg1[%c0, %c0_0] : memref<32x320xbf16, #tpu.memory_space<vmem>>, vector<32x320xbf16>
    %c0_1 = arith.constant 0 : index
    %c0_2 = arith.constant 0 : index
    %1 = vector.load %arg2[%c0_1, %c0_2] : memref<320x128xbf16, #tpu.memory_space<vmem>>, vector<320x128xbf16>
    %cst = arith.constant dense<0.000000e+00> : vector<32x128xf32>
    %2 = tpu.matmul %0, %1, %cst {dimension_numbers = #tpu.dot_dimension_numbers<[1], [0], [0], [1], [0, 0, 1, 1], [], []>} : vector<32x320xbf16>, vector<320x128xbf16>, vector<32x128xf32> -> vector<32x128xf32>
    %c0_3 = arith.constant 0 : index
    %c0_4 = arith.constant 0 : index
    %3 = vector.load %arg3[%c0_3, %c0_4] : memref<32x128xf32, #tpu.memory_space<vmem>>, vector<32x128xf32>
    tpu.vector_store %arg3[%c0_3, %c0_4], %2 {strides = array<i32>} : memref<32x128xf32, #tpu.memory_space<vmem>>, vector<32x128xf32>,
    %cst_5 = arith.constant dense<0.000000e+00> : vector<128xf32>
    %4 = vector.multi_reduction <add>, %2, %cst_5 [0] : vector<32x128xf32> to vector<128xf32>
    %5 = vector.shape_cast %4 : vector<128xf32> to vector<1x128xf32>
    %6 = arith.mulf %2, %2 : vector<32x128xf32>
    %cst_6 = arith.constant dense<0.000000e+00> : vector<128xf32>
    %7 = vector.multi_reduction <add>, %6, %cst_6 [0] : vector<32x128xf32> to vector<128xf32>
    %8 = vector.shape_cast %7 : vector<128xf32> to vector<1x128xf32>
    %9 = tpu.iota {dimensions = array<i32: 0>} : vector<8x128xi32>
    %c0_i32 = arith.constant 0 : i32
    %10 = vector.broadcast %c0_i32 : i32 to vector<8x128xi32>
    %11 = arith.cmpi eq, %9, %10 : vector<8x128xi32>
    %cst_7 = arith.constant 0.000000e+00 : f32
    %12 = vector.shape_cast %5 : vector<1x128xf32> to vector<1x128xf32>
    %13 = vector.broadcast %12 : vector<1x128xf32> to vector<8x128xf32>
    %14 = vector.broadcast %cst_7 : f32 to vector<8x128xf32>
    %15 = arith.select %11, %13, %14 : vector<8x128xi1>, vector<8x128xf32>
    %c0_8 = arith.constant 0 : index
    %c0_9 = arith.constant 0 : index
    %16 = vector.load %arg4[%c0_8, %c0_9] : memref<8x128xf32, #tpu.memory_space<vmem>>, vector<8x128xf32>
    tpu.vector_store %arg4[%c0_8, %c0_9], %15 {strides = array<i32>} : memref<8x128xf32, #tpu.memory_space<vmem>>, vector<8x128xf32>,
    %c0_i32_10 = arith.constant 0 : i32
    %17 = vector.broadcast %c0_i32_10 : i32 to vector<8x128xi32>
    %18 = arith.cmpi eq, %9, %17 : vector<8x128xi32>
    %cst_11 = arith.constant 0.000000e+00 : f32
    %19 = vector.shape_cast %8 : vector<1x128xf32> to vector<1x128xf32>
    %20 = vector.broadcast %19 : vector<1x128xf32> to vector<8x128xf32>
    %21 = vector.broadcast %cst_11 : f32 to vector<8x128xf32>
    %22 = arith.select %18, %20, %21 : vector<8x128xi1>, vector<8x128xf32>
    %c0_12 = arith.constant 0 : index
    %c0_13 = arith.constant 0 : index
    %23 = vector.load %arg5[%c0_12, %c0_13] : memref<8x128xf32, #tpu.memory_space<vmem>>, vector<8x128xf32>
    tpu.vector_store %arg5[%c0_12, %c0_13], %22 {strides = array<i32>} : memref<8x128xf32, #tpu.memory_space<vmem>>, vector<8x128xf32>,
    return
  }
  func.func @transform_0(%arg0: i32) -> (i32, i32) {
    %c0_i32 = arith.constant 0 : i32
    %c0_i32_0 = arith.constant 0 : i32
    return %arg0, %c0_i32 : i32, i32
  }
  func.func @transform_1(%arg0: i32) -> (i32, i32) {
    %c0_i32 = arith.constant 0 : i32
    %c0_i32_0 = arith.constant 0 : i32
    %c0_i32_1 = arith.constant 0 : i32
    return %c0_i32, %c0_i32_0 : i32, i32
  }
  func.func @transform_2(%arg0: i32) -> (i32, i32) {
    %c0_i32 = arith.constant 0 : i32
    %c0_i32_0 = arith.constant 0 : i32
    return %arg0, %c0_i32 : i32, i32
  }
  func.func @transform_3(%arg0: i32) -> (i32, i32) {
    %c0_i32 = arith.constant 0 : i32
    %c0_i32_0 = arith.constant 0 : i32
    return %arg0, %c0_i32 : i32, i32
  }
  func.func @transform_4(%arg0: i32) -> (i32, i32) {
    %c0_i32 = arith.constant 0 : i32
    %c0_i32_0 = arith.constant 0 : i32
    return %arg0, %c0_i32 : i32, i32
  }
}

module attributes {stable_mosaic.version = 11 : i64} {
  func.func @_bn_lrelu_kernel(%arg0: i32, %arg1: memref<32x128xf32, #tpu.memory_space<vmem>>, %arg2: memref<1x128xf32, #tpu.memory_space<vmem>>, %arg3: memref<1x128xf32, #tpu.memory_space<vmem>>, %arg4: memref<32x128xf32, #tpu.memory_space<vmem>>) attributes {dimension_semantics = [#tpu.dimension_semantics<parallel>], iteration_bounds = array<i64: 1>, scalar_prefetch = 0 : i64, scratch_operands = 0 : i64, tpu.core_type = #tpu.core_type<tc>, window_params = [{transform_indices = @transform_0, window_bounds = array<i64: 32, 128>}, {pipeline_mode = #tpu.pipeline_mode<synchronous>, transform_indices = @transform_1, window_bounds = array<i64: 1, 128>}, {pipeline_mode = #tpu.pipeline_mode<synchronous>, transform_indices = @transform_2, window_bounds = array<i64: 1, 128>}, {transform_indices = @transform_3, window_bounds = array<i64: 32, 128>}]} {
    %c0 = arith.constant 0 : index
    %c0_0 = arith.constant 0 : index
    %0 = vector.load %arg1[%c0, %c0_0] : memref<32x128xf32, #tpu.memory_space<vmem>>, vector<32x128xf32>
    %c0_1 = arith.constant 0 : index
    %c0_2 = arith.constant 0 : index
    %1 = vector.load %arg2[%c0_1, %c0_2] : memref<1x128xf32, #tpu.memory_space<vmem>>, vector<1x128xf32>
    %2 = vector.broadcast %1 : vector<1x128xf32> to vector<32x128xf32>
    %3 = arith.subf %0, %2 : vector<32x128xf32>
    %c0_3 = arith.constant 0 : index
    %c0_4 = arith.constant 0 : index
    %4 = vector.load %arg3[%c0_3, %c0_4] : memref<1x128xf32, #tpu.memory_space<vmem>>, vector<1x128xf32>
    %5 = vector.broadcast %4 : vector<1x128xf32> to vector<32x128xf32>
    %6 = arith.mulf %3, %5 : vector<32x128xf32>
    %cst = arith.constant 0.000000e+00 : f32
    %7 = vector.broadcast %cst : f32 to vector<32x128xf32>
    %8 = arith.cmpf oge, %6, %7 : vector<32x128xf32>
    %cst_5 = arith.constant 2.000000e-01 : f32
    %9 = vector.broadcast %cst_5 : f32 to vector<32x128xf32>
    %10 = arith.mulf %9, %6 : vector<32x128xf32>
    %11 = arith.select %8, %6, %10 : vector<32x128xi1>, vector<32x128xf32>
    %c0_6 = arith.constant 0 : index
    %c0_7 = arith.constant 0 : index
    %12 = vector.load %arg4[%c0_6, %c0_7] : memref<32x128xf32, #tpu.memory_space<vmem>>, vector<32x128xf32>
    tpu.vector_store %arg4[%c0_6, %c0_7], %11 {strides = array<i32>} : memref<32x128xf32, #tpu.memory_space<vmem>>, vector<32x128xf32>,
    return
  }
  func.func @transform_0(%arg0: i32) -> (i32, i32) {
    %c0_i32 = arith.constant 0 : i32
    %c0_i32_0 = arith.constant 0 : i32
    return %arg0, %c0_i32 : i32, i32
  }
  func.func @transform_1(%arg0: i32) -> (i32, i32) {
    %c0_i32 = arith.constant 0 : i32
    %c0_i32_0 = arith.constant 0 : i32
    %c0_i32_1 = arith.constant 0 : i32
    return %c0_i32, %c0_i32_0 : i32, i32
  }
  func.func @transform_2(%arg0: i32) -> (i32, i32) {
    %c0_i32 = arith.constant 0 : i32
    %c0_i32_0 = arith.constant 0 : i32
    %c0_i32_1 = arith.constant 0 : i32
    return %c0_i32, %c0_i32_0 : i32, i32
  }
  func.func @transform_3(%arg0: i32) -> (i32, i32) {
    %c0_i32 = arith.constant 0 : i32
    %c0_i32_0 = arith.constant 0 : i32
    return %arg0, %c0_i32 : i32, i32
  }
}

module attributes {stable_mosaic.version = 11 : i64} {
  func.func @_mm_act_kernel(%arg0: i32, %arg1: memref<16x512xbf16, #tpu.memory_space<vmem>>, %arg2: memref<512x128xbf16, #tpu.memory_space<vmem>>, %arg3: memref<16x128xf32, #tpu.memory_space<vmem>>) attributes {dimension_semantics = [#tpu.dimension_semantics<parallel>], iteration_bounds = array<i64: 1>, scalar_prefetch = 0 : i64, scratch_operands = 0 : i64, tpu.core_type = #tpu.core_type<tc>, window_params = [{transform_indices = @transform_0, window_bounds = array<i64: 16, 512>}, {pipeline_mode = #tpu.pipeline_mode<synchronous>, transform_indices = @transform_1, window_bounds = array<i64: 512, 128>}, {transform_indices = @transform_2, window_bounds = array<i64: 16, 128>}]} {
    %c0 = arith.constant 0 : index
    %c0_0 = arith.constant 0 : index
    %0 = vector.load %arg1[%c0, %c0_0] : memref<16x512xbf16, #tpu.memory_space<vmem>>, vector<16x512xbf16>
    %c0_1 = arith.constant 0 : index
    %c0_2 = arith.constant 0 : index
    %1 = vector.load %arg2[%c0_1, %c0_2] : memref<512x128xbf16, #tpu.memory_space<vmem>>, vector<512x128xbf16>
    %cst = arith.constant dense<0.000000e+00> : vector<16x128xf32>
    %2 = tpu.matmul %0, %1, %cst {dimension_numbers = #tpu.dot_dimension_numbers<[1], [0], [0], [1], [0, 0, 1, 1], [], []>} : vector<16x512xbf16>, vector<512x128xbf16>, vector<16x128xf32> -> vector<16x128xf32>
    %cst_3 = arith.constant 0.000000e+00 : f32
    %3 = vector.broadcast %cst_3 : f32 to vector<16x128xf32>
    %4 = arith.subf %3, %2 : vector<16x128xf32>
    %5 = math.exp %4 : vector<16x128xf32>
    %cst_4 = arith.constant 1.000000e+00 : f32
    %6 = vector.broadcast %cst_4 : f32 to vector<16x128xf32>
    %7 = arith.addf %6, %5 : vector<16x128xf32>
    %cst_5 = arith.constant 1.000000e+00 : f32
    %8 = vector.broadcast %cst_5 : f32 to vector<16x128xf32>
    %9 = arith.divf %8, %7 : vector<16x128xf32>
    %c0_6 = arith.constant 0 : index
    %c0_7 = arith.constant 0 : index
    %10 = vector.load %arg3[%c0_6, %c0_7] : memref<16x128xf32, #tpu.memory_space<vmem>>, vector<16x128xf32>
    tpu.vector_store %arg3[%c0_6, %c0_7], %9 {strides = array<i32>} : memref<16x128xf32, #tpu.memory_space<vmem>>, vector<16x128xf32>,
    return
  }
  func.func @transform_0(%arg0: i32) -> (i32, i32) {
    %c0_i32 = arith.constant 0 : i32
    %c0_i32_0 = arith.constant 0 : i32
    return %arg0, %c0_i32 : i32, i32
  }
  func.func @transform_1(%arg0: i32) -> (i32, i32) {
    %c0_i32 = arith.constant 0 : i32
    %c0_i32_0 = arith.constant 0 : i32
    %c0_i32_1 = arith.constant 0 : i32
    return %c0_i32, %c0_i32_0 : i32, i32
  }
  func.func @transform_2(%arg0: i32) -> (i32, i32) {
    %c0_i32 = arith.constant 0 : i32
    %c0_i32_0 = arith.constant 0 : i32
    return %arg0, %c0_i32 : i32, i32
  }
}

</mosaic_0001>

<bundles_post_ra>
// kernel: a_call__.4
= control target key start
LH: loop header
LB: loop body
LE: loop exit
PB: predicated region body
PF: predicated region fallthrough
CT: control target
= control target key end

     0   :  { %vm92_vm0 = vcmask 392192   ;;  %s455_s1 = inlined_call_operand.vmem [shape: bf16[48,128], index: 1, kind: input, shape index: {}]   ;;  %s456_s0 = inlined_call_operand.vmem [shape: bf16[128,48], index: 0, kind: input, shape index: {}]   ;;  %s457_s2 = inlined_call_operand.vmem [shape: f32[128,128], index: 2, kind: output, shape index: {}]  }
   0x1   :  { %v340_v0 = vld [vmem:[%s455_s1] sm:$0xff]   ;;  %v341_v1 = vld [vmem:[%s455_s1 + $0x8] sm:$0xff]   ;;  %v342_v2 = vld [vmem:[%s455_s1 + $0x10] sm:$0xff]  }
   0x2   :  { %312 = vmatprep.subr.bf16.mxu0 %v340_v0  ;;  %334 = vmatprep.subr.bf16.mxu1 %v340_v0  ;;  %v343_v3 = vld [vmem:[%s456_s0] sm:$0xff]   ;;  %v345_v5 = vld [vmem:[%s456_s0 + $0x8] sm:$0xff]   ;;  %v347_v7 = vld [vmem:[%s456_s0 + $0x10] sm:$0xff]  }
   0x3   :  { %313 = vmatpush3.bf16.msra.mxu0 %v340_v0  ;;  %337 = vmatpush3.bf16.msra.mxu1 %v340_v0  ;;  %v344_v4 = vld [vmem:[%s456_s0 + $0x20] sm:$0xff]   ;;  %v346_v6 = vld [vmem:[%s456_s0 + $0x28] sm:$0xff]   ;;  %v348_v8 = vld [vmem:[%s456_s0 + $0x30] sm:$0xff]  }
   0x4   :  { %314 = vmatprep.subr.bf16.mxu0 %v341_v1  ;;  %335 = vmatprep.subr.bf16.mxu1 %v341_v1  ;;  %v349_v9 = vld [vmem:[%s456_s0 + $0x18] sm:$0xff]  }
   0x5   :  { %318 = vmatprep.mubr.msk.bf16.mxu0 %vm92_vm0, %v343_v3  ;;  %326 = vmatprep.mubr.msk.bf16.mxu1 %vm92_vm0, %v344_v4  ;;  %v350_v10 = vld [vmem:[%s456_s0 + $0x38] sm:$0xff]  }
   0x7   :  { %315 = vmatpush3.bf16.msra.mxu0 %v341_v1  ;;  %338 = vmatpush3.bf16.msra.mxu1 %v341_v1 }
   0x8   :  { %316 = vmatprep.subr.bf16.mxu0 %v342_v2  ;;  %336 = vmatprep.subr.bf16.mxu1 %v342_v2 }
   0xb   :  { %317 = vmatpush3.bf16.msra.mxu0 %v342_v2  ;;  %339 = vmatpush3.bf16.msra.mxu1 %v342_v2 }
   0xe   :  { %319 = vmatmul.mubr.msk.bf16.vlgmr.msra.gmra.mrb[0].mxu0 %vm92_vm0, %v345_v5  ;;  %327 = vmatmul.mubr.msk.bf16.vlgmr.msra.gmra.mrb[0].mxu1 %vm92_vm0, %v346_v6 }
   0xf   :  { %322 = vmatprep.mubr.msk.bf16.mxu0 %vm92_vm0, %v347_v7  ;;  %330 = vmatprep.mubr.msk.bf16.mxu1 %vm92_vm0, %v348_v8 }
  0x16   :  { %323 = vmatmul.mubr.msk.bf16.gmra.mrb[4].mxu0 %vm92_vm0, %v349_v9  ;;  %331 = vmatmul.mubr.msk.bf16.gmra.mrb[4].mxu1 %vm92_vm0, %v350_v10 }
  0xe1   :  { %v320_v11 = vpop.f32.mrb[0].mxu0  ;;  %v328_v12 = vpop.f32.mrb[0].mxu1 }
  0xe2   :  { %vm216_vm1 = vcmp.ge.f32.partialorder %v320_v11, 0.0  ;;  %v232_v13 = vmul.f32 0.2, %v320_v11  ;;  %vm224_vm2 = vcmp.ge.f32.partialorder %v328_v12, 0.0  ;;  %v240_v14 = vmul.f32 0.2, %v328_v12 }
  0xe3   :  { %v151_v15 = vpop.f32.mrb[1].mxu0  ;;  %v183_v16 = vpop.f32.mrb[1].mxu1 }
  0xe4   :  { %v248_v17 = vsel %vm216_vm1, %v320_v11, %v232_v13  ;;  %v256_v18 = vsel %vm224_vm2, %v328_v12, %v240_v14  ;;  %vm214_vm3 = vcmp.ge.f32.partialorder %v151_v15, 0.0  ;;  %v230_v19 = vmul.f32 0.2, %v151_v15  ;;  %v321_v20 = vpop.f32.mrb[2].mxu0  ;;  %v329_v21 = vpop.f32.mrb[2].mxu1 }
  0xe5   :  { %264 = vst [vmem:[%s457_s2 + $0x10] sm:$0xff] %v248_v17  ;;  %272 = vst [vmem:[%s457_s2 + $0x50] sm:$0xff] %v256_v18  ;;  %vm222_vm4 = vcmp.ge.f32.partialorder %v183_v16, 0.0  ;;  %v238_v22 = vmul.f32 0.2, %v183_v16  ;;  %vm217_vm5 = vcmp.ge.f32.partialorder %v321_v20, 0.0 }
  0xe6   :  { %v233_v23 = vmul.f32 0.2, %v321_v20  ;;  %v246_v24 = vsel %vm214_vm3, %v151_v15, %v230_v19  ;;  %vm225_vm6 = vcmp.ge.f32.partialorder %v329_v21, 0.0  ;;  %v241_v25 = vmul.f32 0.2, %v329_v21  ;;  %v154_v26 = vpop.f32.mrb[3].mxu0 }
  0xe7   :  { %v186_v27 = vpop.f32.mrb[3].mxu1  ;;  %262 = vst [vmem:[%s457_s2] sm:$0xff] %v246_v24  ;;  %v254_v28 = vsel %vm222_vm4, %v183_v16, %v238_v22  ;;  %vm215_vm7 = vcmp.ge.f32.partialorder %v154_v26, 0.0  ;;  %v231_v30 = vmul.f32 0.2, %v154_v26 }
  0xe8   :  { %v249_v29 = vsel %vm217_vm5, %v321_v20, %v233_v23  ;;  %270 = vst [vmem:[%s457_s2 + $0x40] sm:$0xff] %v254_v28  ;;  %v257_v31 = vsel %vm225_vm6, %v329_v21, %v241_v25  ;;  %vm223_vm8 = vcmp.ge.f32.partialorder %v186_v27, 0.0  ;;  %v239_v32 = vmul.f32 0.2, %v186_v27 }
  0xe9   :  { %265 = vst [vmem:[%s457_s2 + $0x18] sm:$0xff] %v249_v29  ;;  %273 = vst [vmem:[%s457_s2 + $0x58] sm:$0xff] %v257_v31  ;;  %v247_v33 = vsel %vm215_vm7, %v154_v26, %v231_v30  ;;  %v324_v34 = vpop.f32.mrb[4].mxu0  ;;  %v332_v35 = vpop.f32.mrb[4].mxu1 }
  0xea   :  { %263 = vst [vmem:[%s457_s2 + $0x8] sm:$0xff] %v247_v33  ;;  %v255_v36 = vsel %vm223_vm8, %v186_v27, %v239_v32  ;;  %vm220_vm9 = vcmp.ge.f32.partialorder %v324_v34, 0.0  ;;  %v236_v37 = vmul.f32 0.2, %v324_v34  ;;  %vm228_vm10 = vcmp.ge.f32.partialorder %v332_v35, 0.0  ;;  %v167_v38 = vpop.f32.mrb[5].mxu0 }
  0xeb   :  { %v199_v39 = vpop.f32.mrb[5].mxu1  ;;  %271 = vst [vmem:[%s457_s2 + $0x48] sm:$0xff] %v255_v36  ;;  %v244_v40 = vmul.f32 0.2, %v332_v35  ;;  %vm218_vm11 = vcmp.ge.f32.partialorder %v167_v38, 0.0  ;;  %v325_v44 = vpop.f32.mrb[6].mxu0 }
  0xec   :  { %v234_v41 = vmul.f32 0.2, %v167_v38  ;;  %vm226_vm12 = vcmp.ge.f32.partialorder %v199_v39, 0.0  ;;  %v252_v42 = vsel %vm220_vm9, %v324_v34, %v236_v37  ;;  %v242_v43 = vmul.f32 0.2, %v199_v39  ;;  %v333_v45 = vpop.f32.mrb[6].mxu1 }
  0xed   :  { %268 = vst [vmem:[%s457_s2 + $0x30] sm:$0xff] %v252_v42  ;;  %v260_v46 = vsel %vm228_vm10, %v332_v35, %v244_v40  ;;  %vm221_vm13 = vcmp.ge.f32.partialorder %v325_v44, 0.0  ;;  %v237_v48 = vmul.f32 0.2, %v325_v44  ;;  %v170_v49 = vpop.f32.mrb[7].mxu0  ;;  %v202_v50 = vpop.f32.mrb[7].mxu1 }
  0xee   :  { %v250_v47 = vsel %vm218_vm11, %v167_v38, %v234_v41  ;;  %276 = vst [vmem:[%s457_s2 + $0x70] sm:$0xff] %v260_v46  ;;  %v258_v51 = vsel %vm226_vm12, %v199_v39, %v242_v43  ;;  %vm229_vm14 = vcmp.ge.f32.partialorder %v333_v45, 0.0  ;;  %v245_v52 = vmul.f32 0.2, %v333_v45 }
  0xef   :  { %266 = vst [vmem:[%s457_s2 + $0x20] sm:$0xff] %v250_v47  ;;  %vm219_vm15 = vcmp.ge.f32.partialorder %v170_v49, 0.0  ;;  %274 = vst [vmem:[%s457_s2 + $0x60] sm:$0xff] %v258_v51  ;;  %v253_v53 = vsel %vm221_vm13, %v325_v44, %v237_v48  ;;  %v235_v54 = vmul.f32 0.2, %v170_v49  ;;  %vm227_vm0 = vcmp.ge.f32.partialorder %v202_v50, 0.0 }
  0xf0   :  { %v243_v55 = vmul.f32 0.2, %v202_v50  ;;  %269 = vst [vmem:[%s457_s2 + $0x38] sm:$0xff] %v253_v53  ;;  %v261_v56 = vsel %vm229_vm14, %v333_v45, %v245_v52 }
  0xf1   :  { %277 = vst [vmem:[%s457_s2 + $0x78] sm:$0xff] %v261_v56  ;;  %v251_v57 = vsel %vm219_vm15, %v170_v49, %v235_v54 }
  0xf2   :  { %v259_v58 = vsel %vm227_vm0, %v202_v50, %v243_v55  ;;  %267 = vst [vmem:[%s457_s2 + $0x28] sm:$0xff] %v251_v57 }
  0xf3   :  { %275 = vst [vmem:[%s457_s2 + $0x68] sm:$0xff] %v259_v58 }

// kernel: a_call__.6
= control target key start
LH: loop header
LB: loop body
LE: loop exit
PB: predicated region body
PF: predicated region fallthrough
CT: control target
= control target key end

     0   :  { %s112_s0 = inlined_call_operand.vmem [shape: f32[32,128], index: 0, kind: input, shape index: {}]   ;;  %s113_s1 = inlined_call_operand.vmem [shape: f32[1,128], index: 1, kind: input, shape index: {}]   ;;  %s114_s2 = inlined_call_operand.vmem [shape: f32[1,128], index: 2, kind: input, shape index: {}]   ;;  %s115_s3 = inlined_call_operand.vmem [shape: f32[32,128], index: 3, kind: output, shape index: {}]  }
   0x1   :  { %v14_v0 = vld [vmem:[%s112_s0] sm:$0xff]  ;;  %v15_v4 = vld [vmem:[%s112_s0 + $0x8] sm:$0xff]  ;;  %v16_v5 = vld [vmem:[%s112_s0 + $0x10] sm:$0xff] }
   0x2   :  { %v60_v1 = vld [vmem:[%s113_s1] ss:$0 sm:$0xff]  ;;  %v17_v6 = vld [vmem:[%s112_s0 + $0x18] sm:$0xff] }
   0x3   :  { %v61_v2 = vld [vmem:[%s114_s2] ss:$0 sm:$0xff]  ;;  %v25_v3 = vsub.f32 %v14_v0, %v60_v1  ;;  %v26_v7 = vsub.f32 %v15_v4, %v60_v1  ;;  %v27_v8 = vsub.f32 %v16_v5, %v60_v1  ;;  %v28_v9 = vsub.f32 %v17_v6, %v60_v1 }
   0x5   :  { %v36_v10 = vmul.f32 %v61_v2, %v25_v3  ;;  %v37_v11 = vmul.f32 %v61_v2, %v26_v7  ;;  %v38_v12 = vmul.f32 %v61_v2, %v27_v8  ;;  %v39_v13 = vmul.f32 %v61_v2, %v28_v9 }
   0x7   :  { %vm40_vm0 = vcmp.ge.f32.partialorder %v36_v10, 0.0  ;;  %v44_v14 = vmul.f32 0.2, %v36_v10  ;;  %vm41_vm1 = vcmp.ge.f32.partialorder %v37_v11, 0.0  ;;  %v45_v15 = vmul.f32 0.2, %v37_v11 }
   0x8   :  { %vm42_vm2 = vcmp.ge.f32.partialorder %v38_v12, 0.0  ;;  %v46_v16 = vmul.f32 0.2, %v38_v12  ;;  %vm43_vm3 = vcmp.ge.f32.partialorder %v39_v13, 0.0  ;;  %v47_v18 = vmul.f32 0.2, %v39_v13 }
   0x9   :  { %v48_v17 = vsel %vm40_vm0, %v36_v10, %v44_v14  ;;  %v49_v19 = vsel %vm41_vm1, %v37_v11, %v45_v15 }
   0xa   :  { %52 = vst [vmem:[%s115_s3] sm:$0xff] %v48_v17  ;;  %v50_v20 = vsel %vm42_vm2, %v38_v12, %v46_v16  ;;  %53 = vst [vmem:[%s115_s3 + $0x8] sm:$0xff] %v49_v19  ;;  %v51_v21 = vsel %vm43_vm3, %v39_v13, %v47_v18 }
   0xb   :  { %54 = vst [vmem:[%s115_s3 + $0x10] sm:$0xff] %v50_v20  ;;  %55 = vst [vmem:[%s115_s3 + $0x18] sm:$0xff] %v51_v21 }

// kernel: a_call__.5
= control target key start
LH: loop header
LB: loop body
LE: loop exit
PB: predicated region body
PF: predicated region fallthrough
CT: control target
= control target key end

     0   :  { %vm213_vm0 = vcmask 523264   ;;  %v344_v57 = vlaneseq  ;;  %s588_s1 = inlined_call_operand.vmem [shape: bf16[320,128], index: 1, kind: input, shape index: {}]   ;;  %s589_s0 = inlined_call_operand.vmem [shape: bf16[32,320], index: 0, kind: input, shape index: {}]   ;;  %s590_s2 = inlined_call_operand.vmem [shape: f32[32,128], index: 2, kind: output, shape index: {0}]   ;;  %s591_s3 = inlined_call_operand.vmem [shape: f32[8,128], index: 3, kind: output, shape index: {1}]   ;;  %s592_s4 = inlined_call_operand.vmem [shape: f32[8,128], index: 4, kind: output, shape index: {2}]  }
   0x1   :  { %v437_v0 = vld [vmem:[%s588_s1 + $0x40] sm:$0xff]   ;;  %v439_v2 = vld [vmem:[%s588_s1 + $0x48] sm:$0xff]   ;;  %v441_v4 = vld [vmem:[%s588_s1 + $0x50] sm:$0xff]  }
   0x2   :  { %v438_v1 = vld [vmem:[%s588_s1] sm:$0xff]   ;;  %391 = vmatprep.subr.bf16.mxu0 %v437_v0  ;;  %v440_v3 = vld [vmem:[%s588_s1 + $0x8] sm:$0xff]   ;;  %v442_v5 = vld [vmem:[%s588_s1 + $0x10] sm:$0xff]   ;;  %v345_v62 = vshrl.u32 %v344_v57, 7 }
   0x3   :  { %392 = vmatpush3.bf16.msra.mxu0 %v438_v1  ;;  %v443_v6 = vld [vmem:[%s588_s1 + $0x58] sm:$0xff]   ;;  %v447_v7 = vld [vmem:[%s588_s1 + $0x80] sm:$0xff]   ;;  %v450_v10 = vld [vmem:[%s588_s1 + $0x88] sm:$0xff]  }
   0x4   :  { %393 = vmatprep.subr.bf16.mxu0 %v439_v2  ;;  %v444_v8 = vld [vmem:[%s588_s1 + $0x18] sm:$0xff]   ;;  %v445_v9 = vld [vmem:[%s588_s1 + $0x60] sm:$0xff]   ;;  %425 = vmatprep.subr.bf16.mxu1 %v447_v7  ;;  %v448_v12 = vld [vmem:[%s588_s1 + $0x68] sm:$0xff]   ;;  %vm346_vm1 = vcmp.eq.s32.totalorder %v345_v62, 0 }
   0x5   :  { %426 = vmatpush3.bf16.msra.mxu1 %v447_v7  ;;  %v446_v11 = vld [vmem:[%s588_s1 + $0x20] sm:$0xff]   ;;  %v453_v13 = vld [vmem:[%s588_s1 + $0x90] sm:$0xff]   ;;  %v449_v14 = vld [vmem:[%s588_s1 + $0x28] sm:$0xff]  }
   0x6   :  { %427 = vmatprep.subr.bf16.mxu1 %v450_v10  ;;  %v456_v15 = vld [vmem:[%s588_s1 + $0x98] sm:$0xff]   ;;  %v451_v16 = vld [vmem:[%s588_s1 + $0x70] sm:$0xff]   ;;  %v461_v21 = vld [vmem:[%s589_s0 + $0x20] ss:$12 sps:$4 sm:$0xff]  }
   0x7   :  { %394 = vmatpush3.bf16.msra.mxu0 %v440_v3  ;;  %v459_v17 = vld [vmem:[%s589_s0 + $0x4] ss:$12 sps:$4 sm:$0xff]   ;;  %v460_v18 = vld [vmem:[%s589_s0 + $0x8] ss:$12 sps:$4 sm:$0xff]   ;;  %v454_v20 = vld [vmem:[%s588_s1 + $0x78] sm:$0xff]  }
   0x8   :  { %395 = vmatprep.subr.bf16.mxu0 %v441_v4  ;;  %v452_v19 = vld [vmem:[%s588_s1 + $0x30] sm:$0xff]   ;;  %252 = vmatprep.mubr.bf16.mxu0 %v459_v17  ;;  %v455_v22 = vld [vmem:[%s588_s1 + $0x38] sm:$0xff]   ;;  %v457_v23 = vld [vmem:[%s589_s0] ss:$12 sps:$4 sm:$0xff]  }
   0x9   :  { %428 = vmatpush3.bf16.msra.mxu1 %v450_v10  ;;  %433 = vmatprep.mubr.msk.bf16.mxu1 %vm213_vm0, %v460_v18  ;;  %v462_v24 = vld [vmem:[%s589_s0 + $0x1c] ss:$12 sps:$4 sm:$0xff]   ;;  %v464_v25 = vld [vmem:[%s589_s0 + $0x18] ss:$12 sps:$4 sm:$0xff]  }
   0xa   :  { %429 = vmatprep.subr.bf16.mxu1 %v453_v13 }
   0xb   :  { %396 = vmatpush3.bf16.msra.mxu0 %v442_v5 }
   0xc   :  { %397 = vmatprep.subr.bf16.mxu0 %v443_v6 }
   0xd   :  { %430 = vmatpush3.bf16.msra.mxu1 %v453_v13 }
   0xe   :  { %431 = vmatprep.subr.bf16.mxu1 %v456_v15 }
   0xf   :  { %398 = vmatpush3.bf16.msra.mxu0 %v444_v8 }
  0x10   :  { %399 = vmatprep.subr.bf16.mxu0 %v445_v9 }
  0x11   :  { %432 = vmatpush3.bf16.msra.mxu1 %v456_v15 }
  0x13   :  { %400 = vmatpush3.bf16.msra.mxu0 %v446_v11 }
  0x14   :  { %401 = vmatprep.subr.bf16.mxu0 %v448_v12  ;;  %434 = vmatmul.mubr.msk.bf16.vlgmr.msra.gmra.mrb[0].mxu1 %vm213_vm0, %v461_v21 }
  0x17   :  { %402 = vmatpush3.bf16.msra.mxu0 %v449_v14 }
  0x18   :  { %403 = vmatprep.subr.bf16.mxu0 %v451_v16 }
  0x1b   :  { %404 = vmatpush3.bf16.msra.mxu0 %v452_v19 }
  0x1c   :  { %405 = vmatprep.subr.bf16.mxu0 %v454_v20 }
  0x1f   :  { %406 = vmatpush3.bf16.msra.mxu0 %v455_v22 }
  0x22   :  { %253 = vmatmul.mubr.bf16.vlgmr.msra.gmra.mrb[0].mxu0 %v457_v23 }
  0x23   :  { %260 = vmatprep.mubr.bf16.mxu0 %v462_v24 }
  0x2a   :  { %261 = vmatmul.mubr.bf16.gmra.mrb[4].mxu0 %v464_v25 }
  0xe7   :  { %v435_v26 = vpop.f32.mrb[0].mxu1 }
  0xe8   :  { %v303_v27 = vpop.f32.mrb[1].mxu1 }
  0xe9   :  { %v436_v28 = vpop.f32.mrb[2].mxu1 }
  0xea   :  { %v306_v29 = vpop.f32.mrb[3].mxu1 }
  0xf5   :  { %v407_v30 = vpop.f32.mrb[0].mxu0 }
  0xf6   :  { %v408_v31 = vpop.f32.mrb[1].mxu0 }
  0xf7   :  { %v409_v32 = vadd.f32 %v408_v31, %v407_v30  ;;  %v410_v33 = vpop.f32.mrb[2].mxu0 }
  0xf8   :  { %v411_v34 = vpop.f32.mrb[3].mxu0 }
  0xf9   :  { %v412_v35 = vadd.f32 %v411_v34, %v410_v33  ;;  %v304_v36 = vadd.f32 %v409_v32, %v303_v27 }
  0xfb   :  { %318 = vst [vmem:[%s590_s2] sm:$0xff] %v304_v36  ;;  %v307_v37 = vadd.f32 %v412_v35, %v306_v29  ;;  %v331_v38 = vmul.f32 %v304_v36, %v304_v36 }
  0xfd   :  { %319 = vst [vmem:[%s590_s2 + $0x8] sm:$0xff] %v307_v37  ;;  %v322_v39 = vadd.f32 %v307_v37, %v304_v36  ;;  %v332_v40 = vmul.f32 %v307_v37, %v307_v37  ;;  %v413_v41 = vpop.f32.mrb[4].mxu0 }
  0xfe   :  { %v414_v42 = vpop.f32.mrb[5].mxu0 }
  0xff   :  { %v335_v43 = vadd.f32 %v332_v40, %v331_v38  ;;  %v415_v44 = vadd.f32 %v414_v42, %v413_v41  ;;  %v416_v45 = vpop.f32.mrb[6].mxu0 }
 0x100   :  { %v417_v46 = vpop.f32.mrb[7].mxu0 }
 0x101   :  { %v312_v47 = vadd.f32 %v435_v26, %v415_v44  ;;  %v418_v48 = vadd.f32 %v417_v46, %v416_v45 }
 0x103   :  { %320 = vst [vmem:[%s590_s2 + $0x10] sm:$0xff] %v312_v47  ;;  %v323_v49 = vadd.f32 %v322_v39, %v312_v47  ;;  %v333_v50 = vmul.f32 %v312_v47, %v312_v47  ;;  %v315_v51 = vadd.f32 %v436_v28, %v418_v48 }
 0x105   :  { %v336_v52 = vadd.f32 %v335_v43, %v333_v50  ;;  %321 = vst [vmem:[%s590_s2 + $0x18] sm:$0xff] %v315_v51  ;;  %v324_v53 = vadd.f32 %v323_v49, %v315_v51  ;;  %v334_v54 = vmul.f32 %v315_v51, %v315_v51 }
 0x107   :  { %v325_v55 = vrot.slane %v324_v53, 4  ;;  %v337_v56 = vadd.f32 %v336_v52, %v334_v54 }
 0x109   :  { %v326_v58 = vadd.f32 %v325_v55, %v324_v53  ;;  %v338_v59 = vrot.slane %v337_v56, 4 }
 0x10b   :  { %v327_v60 = vrot.slane %v326_v58, 2  ;;  %v339_v61 = vadd.f32 %v338_v59, %v337_v56 }
 0x10d   :  { %v328_v63 = vadd.f32 %v327_v60, %v326_v58  ;;  %v340_v0 = vrot.slane %v339_v61, 2 }
 0x10f   :  { %v329_v1 = vrot.slane %v328_v63, 1  ;;  %v341_v2 = vadd.f32 %v340_v0, %v339_v61 }
 0x111   :  { %v330_v3 = vadd.f32 %v329_v1, %v328_v63  ;;  %v342_v4 = vrot.slane %v341_v2, 1 }
 0x113   :  { %v343_v5 = vadd.f32 %v342_v4, %v341_v2  ;;  %v347_v6 = vsel %vm346_vm1, %v330_v3, 0.0 }
 0x114   :  { %348 = vst [vmem:[%s591_s3] sm:$0xff] %v347_v6 }
 0x115   :  { %v349_v7 = vsel %vm346_vm1, %v343_v5, 0.0 }
 0x116   :  { %350 = vst [vmem:[%s592_s4] sm:$0xff] %v349_v7 }

// kernel: a_call__.7
= control target key start
LH: loop header
LB: loop body
LE: loop exit
PB: predicated region body
PF: predicated region fallthrough
CT: control target
= control target key end

     0   :  { %s647_s1 = inlined_call_operand.vmem [shape: bf16[512,128], index: 1, kind: input, shape index: {}]   ;;  %s648_s0 = inlined_call_operand.vmem [shape: bf16[16,512], index: 0, kind: input, shape index: {}]   ;;  %s649_s2 = inlined_call_operand.vmem [shape: f32[16,128], index: 2, kind: output, shape index: {}]  }
   0x1   :  { %v472_v0 = vld [vmem:[%s647_s1 + $0x40] sm:$0xff]   ;;  %v476_v4 = vld [vmem:[%s647_s1 + $0x48] sm:$0xff]   ;;  %v480_v8 = vld [vmem:[%s647_s1 + $0x50] sm:$0xff]  }
   0x2   :  { %v473_v1 = vld [vmem:[%s647_s1 + $0xc0] sm:$0xff]   ;;  %428 = vmatprep.subr.bf16.mxu0 %v472_v0  ;;  %v477_v5 = vld [vmem:[%s647_s1 + $0xc8] sm:$0xff]   ;;  %v481_v9 = vld [vmem:[%s647_s1 + $0xd0] sm:$0xff]  }
   0x3   :  { %v474_v2 = vld [vmem:[%s647_s1] sm:$0xff]   ;;  %450 = vmatprep.subr.bf16.mxu1 %v473_v1  ;;  %v478_v6 = vld [vmem:[%s647_s1 + $0x8] sm:$0xff]   ;;  %v482_v10 = vld [vmem:[%s647_s1 + $0x10] sm:$0xff]  }
   0x4   :  { %v475_v3 = vld [vmem:[%s647_s1 + $0x80] sm:$0xff]   ;;  %429 = vmatpush3.bf16.msra.mxu0 %v474_v2  ;;  %v479_v7 = vld [vmem:[%s647_s1 + $0x88] sm:$0xff]   ;;  %v483_v11 = vld [vmem:[%s647_s1 + $0x90] sm:$0xff]  }
   0x5   :  { %451 = vmatpush3.bf16.msra.mxu1 %v475_v3  ;;  %430 = vmatprep.subr.bf16.mxu0 %v476_v4  ;;  %v484_v12 = vld [vmem:[%s647_s1 + $0x58] sm:$0xff]   ;;  %v488_v16 = vld [vmem:[%s647_s1 + $0x60] sm:$0xff]   ;;  %v492_v20 = vld [vmem:[%s647_s1 + $0x68] sm:$0xff]  }
   0x6   :  { %452 = vmatprep.subr.bf16.mxu1 %v477_v5  ;;  %v485_v13 = vld [vmem:[%s647_s1 + $0xd8] sm:$0xff]   ;;  %v489_v17 = vld [vmem:[%s647_s1 + $0xe0] sm:$0xff]   ;;  %v493_v21 = vld [vmem:[%s647_s1 + $0xe8] sm:$0xff]  }
   0x7   :  { %v486_v14 = vld [vmem:[%s647_s1 + $0x18] sm:$0xff]   ;;  %v490_v18 = vld [vmem:[%s647_s1 + $0x20] sm:$0xff]   ;;  %v494_v22 = vld [vmem:[%s647_s1 + $0x28] sm:$0xff]  }
   0x8   :  { %431 = vmatpush3.bf16.msra.mxu0 %v478_v6  ;;  %v487_v15 = vld [vmem:[%s647_s1 + $0x98] sm:$0xff]   ;;  %v491_v19 = vld [vmem:[%s647_s1 + $0xa0] sm:$0xff]   ;;  %v495_v23 = vld [vmem:[%s647_s1 + $0xa8] sm:$0xff]  }
   0x9   :  { %453 = vmatpush3.bf16.msra.mxu1 %v479_v7  ;;  %432 = vmatprep.subr.bf16.mxu0 %v480_v8  ;;  %v496_v24 = vld [vmem:[%s647_s1 + $0x70] sm:$0xff]   ;;  %v500_v28 = vld [vmem:[%s647_s1 + $0x78] sm:$0xff]  }
   0xa   :  { %454 = vmatprep.subr.bf16.mxu1 %v481_v9  ;;  %v497_v25 = vld [vmem:[%s647_s1 + $0xf0] sm:$0xff]   ;;  %v501_v29 = vld [vmem:[%s647_s1 + $0xf8] sm:$0xff]  }
   0xb   :  { %v498_v26 = vld [vmem:[%s647_s1 + $0x30] sm:$0xff]   ;;  %v502_v30 = vld [vmem:[%s647_s1 + $0x38] sm:$0xff]  }
   0xc   :  { %433 = vmatpush3.bf16.msra.mxu0 %v482_v10  ;;  %v499_v27 = vld [vmem:[%s647_s1 + $0xb0] sm:$0xff]   ;;  %v503_v31 = vld [vmem:[%s647_s1 + $0xb8] sm:$0xff]  }
   0xd   :  { %455 = vmatpush3.bf16.msra.mxu1 %v483_v11  ;;  %434 = vmatprep.subr.bf16.mxu0 %v484_v12  ;;  %v504_v32 = vld [vmem:[%s648_s0] ss:$16 sps:$4 sm:$0xff]   ;;  %v506_v33 = vld [vmem:[%s648_s0 + $0x4] ss:$16 sps:$4 sm:$0xff]   ;;  %v507_v34 = vld [vmem:[%s648_s0 + $0x8] ss:$16 sps:$4 sm:$0xff]  }
   0xe   :  { %456 = vmatprep.subr.bf16.mxu1 %v485_v13  ;;  %v509_v35 = vld [vmem:[%s648_s0 + $0xc] ss:$16 sps:$4 sm:$0xff]   ;;  %324 = vmatprep.mubr.bf16.mxu0 %v506_v33 }
   0xf   :  { %365 = vmatprep.mubr.bf16.mxu1 %v509_v35 }
  0x10   :  { %435 = vmatpush3.bf16.msra.mxu0 %v486_v14 }
  0x11   :  { %457 = vmatpush3.bf16.msra.mxu1 %v487_v15  ;;  %436 = vmatprep.subr.bf16.mxu0 %v488_v16 }
  0x12   :  { %458 = vmatprep.subr.bf16.mxu1 %v489_v17 }
  0x14   :  { %437 = vmatpush3.bf16.msra.mxu0 %v490_v18 }
  0x15   :  { %459 = vmatpush3.bf16.msra.mxu1 %v491_v19  ;;  %438 = vmatprep.subr.bf16.mxu0 %v492_v20 }
  0x16   :  { %460 = vmatprep.subr.bf16.mxu1 %v493_v21 }
  0x18   :  { %439 = vmatpush3.bf16.msra.mxu0 %v494_v22 }
  0x19   :  { %461 = vmatpush3.bf16.msra.mxu1 %v495_v23  ;;  %440 = vmatprep.subr.bf16.mxu0 %v496_v24 }
  0x1a   :  { %462 = vmatprep.subr.bf16.mxu1 %v497_v25 }
  0x1c   :  { %441 = vmatpush3.bf16.msra.mxu0 %v498_v26 }
  0x1d   :  { %463 = vmatpush3.bf16.msra.mxu1 %v499_v27  ;;  %442 = vmatprep.subr.bf16.mxu0 %v500_v28 }
  0x1e   :  { %464 = vmatprep.subr.bf16.mxu1 %v501_v29 }
  0x20   :  { %443 = vmatpush3.bf16.msra.mxu0 %v502_v30 }
  0x21   :  { %465 = vmatpush3.bf16.msra.mxu1 %v503_v31 }
  0x23   :  { %325 = vmatmul.mubr.bf16.vlgmr.msra.gmra.mrb[0].mxu0 %v504_v32 }
  0x24   :  { %366 = vmatmul.mubr.bf16.vlgmr.msra.gmra.mrb[0].mxu1 %v507_v34 }
  0xf6   :  { %v444_v36 = vpop.f32.mrb[0].mxu0 }
  0xf7   :  { %v466_v37 = vpop.f32.mrb[0].mxu1  ;;  %v445_v38 = vpop.f32.mrb[1].mxu0 }
  0xf8   :  { %v446_v39 = vadd.f32 %v445_v38, %v444_v36  ;;  %v467_v40 = vpop.f32.mrb[1].mxu1  ;;  %v447_v41 = vpop.f32.mrb[2].mxu0 }
  0xf9   :  { %v468_v42 = vadd.f32 %v467_v40, %v466_v37  ;;  %v469_v43 = vpop.f32.mrb[2].mxu1  ;;  %v448_v44 = vpop.f32.mrb[3].mxu0 }
  0xfa   :  { %v449_v45 = vadd.f32 %v448_v44, %v447_v41  ;;  %v470_v46 = vpop.f32.mrb[3].mxu1 }
  0xfb   :  { %v368_v47 = vadd.f32 %v468_v42, %v446_v39  ;;  %v471_v48 = vadd.f32 %v470_v46, %v469_v43 }
  0xfd   :  { %v374_v49 = vsub.f32 0.0, %v368_v47  ;;  %v371_v50 = vadd.f32 %v471_v48, %v449_v45 }
  0xff   :  { %v376_v51 = vmul.f32 1.442695, %v374_v49  ;;  %v375_v52 = vsub.f32 0.0, %v371_v50 }
 0x101   :  { %510 = vpow2.f32 %v376_v51  ;;  %v378_v53 = vmul.f32 1.442695, %v375_v52 }
 0x103   :  { %512 = vpow2.f32 %v378_v53 }
 0x10b   :  { %v511_v54 = vpop.eup %510 }
 0x10c   :  { %v380_v55 = vadd.f32 1.0, %v511_v54 }
 0x10d   :  { %v513_v56 = vpop.eup %512 }
 0x10e   :  { %514 = vrcp.f32 %v380_v55  ;;  %v381_v57 = vadd.f32 1.0, %v513_v56 }
 0x110   :  { %516 = vrcp.f32 %v381_v57 }
 0x118   :  { %v515_v58 = vpop.eup %514 }
 0x119   :  { %386 = vst [vmem:[%s649_s2] sm:$0xff] %v515_v58 }
 0x11a   :  { %v517_v59 = vpop.eup %516 }
 0x11b   :  { %387 = vst [vmem:[%s649_s2 + $0x8] sm:$0xff] %v517_v59 }

</bundles_post_ra>
